<compile_context>
chip_gen: v7x
topology: tpu7x:2x2x1
jax: 0.10.0
libtpu: 0.0.40
codegen_flags: <defaults>
</compile_context>

<pallas_src>
import functools

import jax
import jax.numpy as jnp
from jax.experimental import pallas as pl
from jax.experimental.pallas import tpu as pltpu


def _pad_prompt_kernel(prompt_ref, x_ref, o_ref, *, p_eps):
    # All refs are identically shaped VMEM tiles; the prompt's batch block
    # index is always 0 (shared across samples).
    o_ref[...] = x_ref[...] + jnp.asarray(p_eps, x_ref.dtype) * prompt_ref[...]


def _assemble_prompt(pad_up, pad_down, pad_left, pad_right, c, base_size, dtype):
    base = jnp.zeros((1, c, base_size, base_size), dtype=dtype)
    prompt = jnp.concatenate([pad_left, base, pad_right], axis=3)
    prompt = jnp.concatenate([pad_up, prompt, pad_down], axis=2)
    return prompt


def _choose_layout(total, itemsize, target_tile_bytes):
    """Pick (lane, row_tile) so a per-sample slab of `total` elements reshapes
    to (rows, lane) with lane a multiple of 128 and row_tile exactly dividing
    rows (sublane-aligned or full extent).  Prefer tiles that are not tiny,
    then more grid depth, then wider lanes.  Returns None if no lane works."""
    sublane = {4: 8, 2: 16, 1: 32}.get(itemsize, 8)
    best = None
    best_score = None
    for lane in (1024, 512, 256, 128):
        if total % lane:
            continue
        rows = total // lane
        max_tr = max(sublane, target_tile_bytes // (lane * itemsize))
        tr = rows  # full extent is always a legal block shape
        for cand in range(sublane, min(rows, max_tr) + 1, sublane):
            if rows % cand == 0:
                tr = cand  # keep the largest sublane-aligned divisor <= target
        tile_bytes = tr * lane * itemsize
        row_tiles = rows // tr
        score = (tile_bytes >= target_tile_bytes // 4, min(row_tiles, 16), lane)
        if best_score is None or score > best_score:
            best_score = score
            best = (lane, tr)
    return best


def pad_prompter_forward(x, pad_up, pad_down, pad_left, pad_right, p_eps,
                         *, target_tile_bytes=512 * 1024, donate_x=False):
    """x: (N, C, H, W); pads follow the PyTorch parameter shapes."""
    n, c, h, w = x.shape
    pad_size = pad_up.shape[2]
    base_size = h - 2 * pad_size
    assert h == w and base_size > 0, "PadPrompter assumes square images with H > 2*pad_size"

    prompt = _assemble_prompt(pad_up, pad_down, pad_left, pad_right, c, base_size, x.dtype)
    kernel = functools.partial(_pad_prompt_kernel, p_eps=float(p_eps))
    aliases = {1: 0} if donate_x else {}

    total = c * h * w
    itemsize = jnp.dtype(x.dtype).itemsize
    layout = _choose_layout(total, itemsize, target_tile_bytes)

    if layout is None:
        # Fallback (C*H*W not a multiple of 128): per-sample whole-image blocks.
        # Correct, just not lane-dense.
        return pl.pallas_call(
            kernel,
            out_shape=jax.ShapeDtypeStruct((n, c, h, w), x.dtype),
            grid=(n,),
            in_specs=[
                pl.BlockSpec((1, c, h, w), lambda i: (0, 0, 0, 0)),  # shared prompt
                pl.BlockSpec((1, c, h, w), lambda i: (i, 0, 0, 0)),  # x
            ],
            out_specs=pl.BlockSpec((1, c, h, w), lambda i: (i, 0, 0, 0)),
            input_output_aliases=aliases,
            compiler_params=pltpu.CompilerParams(dimension_semantics=("parallel",)),
        )(prompt, x)

    lane, tr = layout
    rows = total // lane
    row_tiles = rows // tr

    # Free reshapes: contiguous NCHW -> lane-dense (rows, lane) slabs.
    x3 = x.reshape(n, rows, lane)
    prompt3 = prompt.reshape(1, rows, lane)

    out3 = pl.pallas_call(
        kernel,
        out_shape=jax.ShapeDtypeStruct((n, rows, lane), x.dtype),
        # Batch is the innermost grid axis; the prompt block index (j) does not
        # change across consecutive steps, so the prompt is read from HBM once
        # per row tile instead of once per sample.
        grid=(row_tiles, n),
        in_specs=[
            pl.BlockSpec((1, tr, lane), lambda j, i: (0, j, 0)),  # shared prompt
            pl.BlockSpec((1, tr, lane), lambda j, i: (i, j, 0)),  # x
        ],
        out_specs=pl.BlockSpec((1, tr, lane), lambda j, i: (i, j, 0)),
        input_output_aliases=aliases,
        compiler_params=pltpu.CompilerParams(
            dimension_semantics=("parallel", "parallel"),
        ),
    )(prompt3, x3)
    return out3.reshape(n, c, h, w)


if __name__ == "__main__":
    # Small shapes consistent with the module's structure (module hardcodes
    # image_size=224, pad_size=30, 3 channels; scaled down: image_size=32, pad_size=4).
    batch = 2
    channels = 3
    image_size = 32
    pad_size = 4
    base_size = image_size - 2 * pad_size
    p_eps = 0.1

    key = jax.random.PRNGKey(0)
    k_x, k_up, k_dn, k_lf, k_rt = jax.random.split(key, 5)

    x = jax.random.normal(k_x, (batch, channels, image_size, image_size), jnp.float32)
    pad_up = jax.random.normal(k_up, (1, channels, pad_size, image_size), jnp.float32)
    pad_down = jax.random.normal(k_dn, (1, channels, pad_size, image_size), jnp.float32)
    pad_left = jax.random.normal(k_lf, (1, channels, base_size, pad_size), jnp.float32)
    pad_right = jax.random.normal(k_rt, (1, channels, base_size, pad_size), jnp.float32)

    out = pad_prompter_forward(x, pad_up, pad_down, pad_left, pad_right, p_eps)
    out = jax.block_until_ready(out)

    # Pure-JAX reference check.
    base = jnp.zeros((1, channels, base_size, base_size), jnp.float32)
    prompt_ref = jnp.concatenate([pad_left, base, pad_right], axis=3)
    prompt_ref = jnp.concatenate([pad_up, prompt_ref, pad_down], axis=2)
    ref = x + p_eps * prompt_ref

    assert out.shape == x.shape and out.dtype == x.dtype
    assert jnp.allclose(out, ref, atol=1e-6, rtol=1e-6)
    print("KERNEL_OK")
</pallas_src>

<mosaic_0001>
module attributes {stable_mosaic.version = 11 : i64} {
  func.func @_pad_prompt_kernel(%arg0: i32, %arg1: i32, %arg2: memref<1x3x1024xf32, #tpu.memory_space<vmem>>, %arg3: memref<1x3x1024xf32, #tpu.memory_space<vmem>>, %arg4: memref<1x3x1024xf32, #tpu.memory_space<vmem>>) attributes {dimension_semantics = [#tpu.dimension_semantics<parallel>, #tpu.dimension_semantics<parallel>], iteration_bounds = array<i64: 1, 2>, scalar_prefetch = 0 : i64, scratch_operands = 0 : i64, tpu.core_type = #tpu.core_type<tc>, window_params = [{transform_indices = @transform_0, window_bounds = array<i64: 1, 3, 1024>}, {transform_indices = @transform_1, window_bounds = array<i64: 1, 3, 1024>}, {transform_indices = @transform_2, window_bounds = array<i64: 1, 3, 1024>}]} {
    %c0 = arith.constant 0 : index
    %c0_0 = arith.constant 0 : index
    %c0_1 = arith.constant 0 : index
    %0 = vector.load %arg3[%c0, %c0_0, %c0_1] : memref<1x3x1024xf32, #tpu.memory_space<vmem>>, vector<1x3x1024xf32>
    %c0_2 = arith.constant 0 : index
    %c0_3 = arith.constant 0 : index
    %c0_4 = arith.constant 0 : index
    %1 = vector.load %arg2[%c0_2, %c0_3, %c0_4] : memref<1x3x1024xf32, #tpu.memory_space<vmem>>, vector<1x3x1024xf32>
    %cst = arith.constant 1.000000e-01 : f32
    %2 = vector.broadcast %cst : f32 to vector<1x3x1024xf32>
    %3 = arith.mulf %2, %1 : vector<1x3x1024xf32>
    %4 = arith.addf %0, %3 : vector<1x3x1024xf32>
    %c0_5 = arith.constant 0 : index
    %c0_6 = arith.constant 0 : index
    %c0_7 = arith.constant 0 : index
    %5 = vector.load %arg4[%c0_5, %c0_6, %c0_7] : memref<1x3x1024xf32, #tpu.memory_space<vmem>>, vector<1x3x1024xf32>
    tpu.vector_store %arg4[%c0_5, %c0_6, %c0_7], %4 {strides = array<i32>} : memref<1x3x1024xf32, #tpu.memory_space<vmem>>, vector<1x3x1024xf32>,
    return
  }
  func.func @transform_0(%arg0: i32, %arg1: i32) -> (i32, i32, i32) {
    %c0_i32 = arith.constant 0 : i32
    %c0_i32_0 = arith.constant 0 : i32
    %c0_i32_1 = arith.constant 0 : i32
    return %c0_i32, %arg0, %c0_i32_0 : i32, i32, i32
  }
  func.func @transform_1(%arg0: i32, %arg1: i32) -> (i32, i32, i32) {
    %c0_i32 = arith.constant 0 : i32
    %c0_i32_0 = arith.constant 0 : i32
    return %arg1, %arg0, %c0_i32 : i32, i32, i32
  }
  func.func @transform_2(%arg0: i32, %arg1: i32) -> (i32, i32, i32) {
    %c0_i32 = arith.constant 0 : i32
    %c0_i32_0 = arith.constant 0 : i32
    return %arg1, %arg0, %c0_i32 : i32, i32, i32
  }
}

</mosaic_0001>

<bundles_post_ra>
// kernel: tpu_custom_call.1
= control target key start
LH: loop header
LB: loop body
LE: loop exit
PB: predicated region body
PF: predicated region fallthrough
CT: control target
= control target key end

     0   :  { %s405_s9 = smov 0   ;;  %s407_s10 = smov 0   ;;  %s450_s0 = inlined_call_operand.vmem [shape: f32[1,3,1024], index: 0, kind: input, shape index: {}]   ;;  %s451_s1 = inlined_call_operand.vmem [shape: f32[2,3,1024], index: 1, kind: input, shape index: {}]   ;;  %s452_s2 = inlined_call_operand.vmem [shape: f32[2,3,1024], index: 2, kind: output, shape index: {}]  }
   0x1   :  { %s409_s11 = smov 0  }
   0x2 LB: > { %s21_s12 = sadd.s32 1, %s384_s10  ;;  %p333_p0 = scmp.ge.s32.totalorder %s388_s11, 1  ;;  %s388_s11 = sphi %s409_s11, %s12_s11   ;;  %s384_s10 = sphi %s407_s10, %s454_s10   ;;  %s380_s9 = sphi %s405_s9, %s453_s9  }
   0x3   : > { %p22_p1 = scmp.ge.s32.totalorder %s21_s12, 2  ;;  %p142_p2 = scmp.lt.s32.totalorder %s388_s11, 3 }
   0x5   : > { %s456_s12 = smov (%p22_p1, %s21_s12), 0  ;;  %p143_p3 = pnand %p333_p0, %p142_p2 }
   0x6   : > { %p182_p4 = scmp.lt.s32.totalorder (!%p143_p3), %s380_s9, 1  ;;  %v204_v0 = vld [vmem:[%s450_s0] sm:$0x77] (!%p143_p3)  ;;  %v205_v1 = vld [vmem:[%s450_s0 + $0x8] sm:$0x77] (!%p143_p3) }
   0x7   : > { %146 = sbr.rel (%p143_p3) target bundleno = 22 (0x16), region = 28  ;;  %v206_v2 = vld [vmem:[%s450_s0 + $0x10] sm:$0x77] (!%p143_p3)  ;;  %v207_v3 = vld [vmem:[%s450_s0 + $0x18] sm:$0x77] (!%p143_p3) }
   0x8   : > { %v208_v4 = vmul.f32 (!%p143_p3), 0.1, %v204_v0  ;;  %v209_v5 = vmul.f32 (!%p143_p3), 0.1, %v205_v1  ;;  %v210_v6 = vmul.f32 (!%p143_p3), 0.1, %v206_v2 }
   0x9   : > { %v211_v7 = vmul.f32 (!%p143_p3), 0.1, %v207_v3 }
   0xe   : > { %s458_s9 = smov (!%p182_p4, %s380_s9), 1 }
   0xf   : > { %s340_s21 = sshll.u32 %s458_s9, 5 }
  0x10   : > { %s190_s24 = scalar_lea.vmem %s451_s1, %s340_s21  ;;  %s199_s27 = scalar_lea.vmem %s452_s2, %s340_s21 }
  0x11   : > { %v200_v8 = vld [vmem:[%s190_s24] sm:$0x77]  ;;  %v201_v9 = vld [vmem:[%s190_s24 + $0x8] sm:$0x77]  ;;  %v202_v10 = vld [vmem:[%s190_s24 + $0x10] sm:$0x77] }
  0x12   : > { %v212_v11 = vadd.f32 %v208_v4, %v200_v8  ;;  %v213_v12 = vadd.f32 %v209_v5, %v201_v9  ;;  %v214_v13 = vadd.f32 %v210_v6, %v202_v10  ;;  %v203_v14 = vld [vmem:[%s190_s24 + $0x18] sm:$0x77] }
  0x13   : > { %v215_v15 = vadd.f32 %v211_v7, %v203_v14 }
  0x14   : > { %216 = vst [vmem:[%s199_s27] sm:$0x77] %v212_v11  ;;  %217 = vst [vmem:[%s199_s27 + $0x8] sm:$0x77] %v213_v12 }
  0x15   : > { %218 = vst [vmem:[%s199_s27 + $0x10] sm:$0x77] %v214_v13  ;;  %219 = vst [vmem:[%s199_s27 + $0x18] sm:$0x77] %v215_v15 }
  0x16 PF: > { %s12_s11 = sadd.s32 1, %s388_s11   ;;  %s453_s9 = smov %s384_s10 }
  0x17   : > { %p9_p5 = scmp.ge.s32.totalorder %s12_s11, 4   ;;  %s454_s10 = smov %s456_s12 }
  0x19   :  { %11 = sbr.rel (!%p9_p5) target bundleno = 2 (0x2), region = 61 }

</bundles_post_ra>
